<compile_context>
chip_gen: v7x
topology: tpu7x:2x2x1
jax: 0.10.0
libtpu: 0.0.40
codegen_flags: <defaults>
</compile_context>

<pallas_src>
import jax
import jax.numpy as jnp
from jax.experimental import pallas as pl
from jax.experimental.pallas import tpu as pltpu


def mlp_kernel(x_ref, w1_ref, b1_ref, w2_ref, b2_ref, w3c_ref, b3_ref, o_ref):
    # x:  (TB, 10) f32        (streamed per grid step)
    # w1: (64, 10) bf16   b1: (64, 1) f32
    # w2: (32, 64) bf16   b2: (32, 1) f32
    # w3c:(32, 1)  f32    b3: (1, 1)  f32
    # o:  (1, TB)  bf16        (lane-dense, batch on lanes)
    xt = x_ref[...].T.astype(jnp.bfloat16)                        # (10, TB) bf16, XLU flip
    h1 = jnp.dot(w1_ref[...], xt, preferred_element_type=jnp.float32) + b1_ref[...]
    h1 = jnp.maximum(h1, 0.0).astype(jnp.bfloat16)                # (64, TB) -> bf16 MXU operand
    h2 = jnp.dot(w2_ref[...], h1, preferred_element_type=jnp.float32) + b2_ref[...]
    h2 = jnp.maximum(h2, 0.0)                                     # (32, TB) f32
    # fc3: (1,32)x(32,TB) as broadcast-mul + sublane reduce (VPU+XLU, skips the MXU).
    out = jnp.sum(w3c_ref[...] * h2, axis=0, keepdims=True) + b3_ref[...]
    o_ref[...] = out.astype(o_ref.dtype)                          # (1, TB) bf16


def simple_nn_forward(x, params, *, block_b=16384):
    w1, b1, w2, b2, w3, b3 = params          # PyTorch layout: W (out, in), b (out,)
    x = x.astype(jnp.float32)
    B, F = x.shape
    assert F == 10

    # Lane-aligned batch tile.  Keep it as big as block_b allows (amortizes per-step
    # overhead), but keep >= 2 grid steps when the batch allows it so "parallel" batch
    # sharding can use both TensorCores on v7x.
    b128 = ((B + 127) // 128) * 128
    TB = min(block_b, b128)
    if b128 >= 2 * 128 and b128 // TB < 2:
        TB = ((-(-b128 // 2) + 127) // 128) * 128
    B_pad = -(-b128 // TB) * TB
    if B_pad != B:
        x = jnp.pad(x, ((0, B_pad - B), (0, 0)))

    # Kernel-side parameter layouts: bf16 matmul weights, f32 column biases,
    # fc3 weight as a (32, 1) f32 column for the VPU/XLU path.
    w1b = w1.astype(jnp.bfloat16)
    w2b = w2.astype(jnp.bfloat16)
    b1c = b1.reshape(64, 1).astype(jnp.float32)
    b2c = b2.reshape(32, 1).astype(jnp.float32)
    w3c = w3.reshape(32, 1).astype(jnp.float32)
    b3c = b3.reshape(1, 1).astype(jnp.float32)

    grid = (B_pad // TB,)
    const = lambda i: (0, 0)                 # parameters stay resident across all tiles

    flops = 2 * B_pad * (10 * 64 + 64 * 32 + 32 * 1)
    bytes_accessed = (B_pad * 10 * 4                       # x read (f32)
                      + B_pad * 1 * 2                      # out write (bf16)
                      + 2 * (64 * 10 + 32 * 64)            # bf16 weights
                      + 4 * (64 + 32 + 32 + 1))            # f32 biases + fc3 column

    out = pl.pallas_call(
        mlp_kernel,
        out_shape=jax.ShapeDtypeStruct((1, B_pad), jnp.bfloat16),
        grid=grid,
        in_specs=[
            pl.BlockSpec((TB, 10), lambda i: (i, 0)),   # x tile: streamed per grid step
            pl.BlockSpec((64, 10), const),              # w1 (bf16)
            pl.BlockSpec((64, 1), const),               # b1
            pl.BlockSpec((32, 64), const),              # w2 (bf16)
            pl.BlockSpec((32, 1), const),               # b2
            pl.BlockSpec((32, 1), const),               # w3 column
            pl.BlockSpec((1, 1), const),                # b3
        ],
        out_specs=pl.BlockSpec((1, TB), lambda i: (0, i)),
        compiler_params=pltpu.CompilerParams(
            dimension_semantics=("parallel",),
            vmem_limit_bytes=48 * 1024 * 1024,
        ),
        cost_estimate=pl.CostEstimate(flops=flops, transcendentals=0,
                                      bytes_accessed=bytes_accessed),
    )(x, w1b, b1c, w2b, b2c, w3c, b3c)

    return out[:, :B].T.astype(jnp.float32)  # back to (B, 1) f32


def init_params(key):
    # Deterministic init mirroring nn.Linear: W (out, in), b (out,), U(-1/sqrt(fan_in), +).
    def linear(key, fan_in, fan_out):
        kw, kb = jax.random.split(key)
        bound = 1.0 / jnp.sqrt(fan_in)
        w = jax.random.uniform(kw, (fan_out, fan_in), jnp.float32, -bound, bound)
        b = jax.random.uniform(kb, (fan_out,), jnp.float32, -bound, bound)
        return w, b

    k1, k2, k3 = jax.random.split(key, 3)
    w1, b1 = linear(k1, 10, 64)
    w2, b2 = linear(k2, 64, 32)
    w3, b3 = linear(k3, 32, 1)
    return w1, b1, w2, b2, w3, b3


if __name__ == "__main__":
    key = jax.random.PRNGKey(0)
    kx, kp = jax.random.split(key)
    B = 8
    x = jax.random.normal(kx, (B, 10), jnp.float32)  # batch=8, in_features=10
    params = init_params(kp)

    out = simple_nn_forward(x, params)
    jax.block_until_ready(out)
    assert out.shape == (B, 1), out.shape

    w1, b1, w2, b2, w3, b3 = params

    # (a) Reference mirroring the kernel's bf16 quantization points (tight check).
    xq = x.astype(jnp.bfloat16).astype(jnp.float32)
    w1q = w1.astype(jnp.bfloat16).astype(jnp.float32)
    w2q = w2.astype(jnp.bfloat16).astype(jnp.float32)
    h1 = jnp.maximum(xq @ w1q.T + b1, 0.0).astype(jnp.bfloat16).astype(jnp.float32)
    h2 = jnp.maximum(h1 @ w2q.T + b2, 0.0)
    ref_q = (h2 @ w3.T + b3).astype(jnp.bfloat16).astype(jnp.float32)
    assert jnp.allclose(out, ref_q, atol=5e-3, rtol=5e-3), float(jnp.max(jnp.abs(out - ref_q)))

    # (b) Pure-f32 reference of the PyTorch module semantics (loose check, bf16 paths).
    ref = jnp.maximum(x @ w1.T + b1, 0.0)
    ref = jnp.maximum(ref @ w2.T + b2, 0.0)
    ref = ref @ w3.T + b3
    assert jnp.allclose(out, ref, atol=5e-2, rtol=5e-2), float(jnp.max(jnp.abs(out - ref)))

    # TODO(synk): nn.MSELoss is defined in __init__ but unused in forward(); not implemented.
    print("KERNEL_OK")
</pallas_src>

<mosaic_0001>
module attributes {stable_mosaic.version = 11 : i64} {
  func.func @mlp_kernel(%arg0: i32, %arg1: memref<128x10xf32, #tpu.memory_space<vmem>>, %arg2: memref<64x10xbf16, #tpu.memory_space<vmem>>, %arg3: memref<64x1xf32, #tpu.memory_space<vmem>>, %arg4: memref<32x64xbf16, #tpu.memory_space<vmem>>, %arg5: memref<32x1xf32, #tpu.memory_space<vmem>>, %arg6: memref<32x1xf32, #tpu.memory_space<vmem>>, %arg7: memref<1x1xf32, #tpu.memory_space<vmem>>, %arg8: memref<1x128xbf16, #tpu.memory_space<vmem>>) attributes {dimension_semantics = [#tpu.dimension_semantics<parallel>], iteration_bounds = array<i64: 1>, scalar_prefetch = 0 : i64, scratch_operands = 0 : i64, tpu.core_type = #tpu.core_type<tc>, window_params = [{transform_indices = @transform_0, window_bounds = array<i64: 128, 10>}, {pipeline_mode = #tpu.pipeline_mode<synchronous>, transform_indices = @transform_1, window_bounds = array<i64: 64, 10>}, {pipeline_mode = #tpu.pipeline_mode<synchronous>, transform_indices = @transform_2, window_bounds = array<i64: 64, 1>}, {pipeline_mode = #tpu.pipeline_mode<synchronous>, transform_indices = @transform_3, window_bounds = array<i64: 32, 64>}, {pipeline_mode = #tpu.pipeline_mode<synchronous>, transform_indices = @transform_4, window_bounds = array<i64: 32, 1>}, {pipeline_mode = #tpu.pipeline_mode<synchronous>, transform_indices = @transform_5, window_bounds = array<i64: 32, 1>}, {pipeline_mode = #tpu.pipeline_mode<synchronous>, transform_indices = @transform_6, window_bounds = array<i64: 1, 1>}, {transform_indices = @transform_7, window_bounds = array<i64: 1, 128>}]} {
    %c0 = arith.constant 0 : index
    %c0_0 = arith.constant 0 : index
    %0 = vector.load %arg1[%c0, %c0_0] : memref<128x10xf32, #tpu.memory_space<vmem>>, vector<128x10xf32>
    %1 = tpu.transpose %0, [1, 0] : vector<128x10xf32> -> vector<10x128xf32>
    %2 = arith.truncf %1 : vector<10x128xf32> to vector<10x128xbf16>
    %c0_1 = arith.constant 0 : index
    %c0_2 = arith.constant 0 : index
    %3 = vector.load %arg2[%c0_1, %c0_2] : memref<64x10xbf16, #tpu.memory_space<vmem>>, vector<64x10xbf16>
    %cst = arith.constant dense<0.000000e+00> : vector<64x128xf32>
    %4 = tpu.matmul %3, %2, %cst {dimension_numbers = #tpu.dot_dimension_numbers<[1], [0], [0], [1], [0, 0, 1, 1], [], []>} : vector<64x10xbf16>, vector<10x128xbf16>, vector<64x128xf32> -> vector<64x128xf32>
    %c0_3 = arith.constant 0 : index
    %c0_4 = arith.constant 0 : index
    %5 = vector.load %arg3[%c0_3, %c0_4] : memref<64x1xf32, #tpu.memory_space<vmem>>, vector<64x1xf32>
    %6 = vector.broadcast %5 : vector<64x1xf32> to vector<64x128xf32>
    %7 = arith.addf %4, %6 : vector<64x128xf32>
    %cst_5 = arith.constant 0.000000e+00 : f32
    %8 = vector.broadcast %cst_5 : f32 to vector<64x128xf32>
    %9 = arith.maximumf %7, %8 : vector<64x128xf32>
    %10 = arith.truncf %9 : vector<64x128xf32> to vector<64x128xbf16>
    %c0_6 = arith.constant 0 : index
    %c0_7 = arith.constant 0 : index
    %11 = vector.load %arg4[%c0_6, %c0_7] : memref<32x64xbf16, #tpu.memory_space<vmem>>, vector<32x64xbf16>
    %cst_8 = arith.constant dense<0.000000e+00> : vector<32x128xf32>
    %12 = tpu.matmul %11, %10, %cst_8 {dimension_numbers = #tpu.dot_dimension_numbers<[1], [0], [0], [1], [0, 0, 1, 1], [], []>} : vector<32x64xbf16>, vector<64x128xbf16>, vector<32x128xf32> -> vector<32x128xf32>
    %c0_9 = arith.constant 0 : index
    %c0_10 = arith.constant 0 : index
    %13 = vector.load %arg5[%c0_9, %c0_10] : memref<32x1xf32, #tpu.memory_space<vmem>>, vector<32x1xf32>
    %14 = vector.broadcast %13 : vector<32x1xf32> to vector<32x128xf32>
    %15 = arith.addf %12, %14 : vector<32x128xf32>
    %cst_11 = arith.constant 0.000000e+00 : f32
    %16 = vector.broadcast %cst_11 : f32 to vector<32x128xf32>
    %17 = arith.maximumf %15, %16 : vector<32x128xf32>
    %c0_12 = arith.constant 0 : index
    %c0_13 = arith.constant 0 : index
    %18 = vector.load %arg6[%c0_12, %c0_13] : memref<32x1xf32, #tpu.memory_space<vmem>>, vector<32x1xf32>
    %19 = vector.broadcast %18 : vector<32x1xf32> to vector<32x128xf32>
    %20 = arith.mulf %19, %17 : vector<32x128xf32>
    %cst_14 = arith.constant dense<0.000000e+00> : vector<128xf32>
    %21 = vector.multi_reduction <add>, %20, %cst_14 [0] : vector<32x128xf32> to vector<128xf32>
    %22 = vector.shape_cast %21 : vector<128xf32> to vector<1x128xf32>
    %c0_15 = arith.constant 0 : index
    %c0_16 = arith.constant 0 : index
    %23 = vector.load %arg7[%c0_15, %c0_16] : memref<1x1xf32, #tpu.memory_space<vmem>>, vector<1x1xf32>
    %24 = vector.broadcast %23 : vector<1x1xf32> to vector<1x128xf32>
    %25 = arith.addf %22, %24 : vector<1x128xf32>
    %26 = arith.truncf %25 : vector<1x128xf32> to vector<1x128xbf16>
    %c0_17 = arith.constant 0 : index
    %c0_18 = arith.constant 0 : index
    %27 = vector.load %arg8[%c0_17, %c0_18] : memref<1x128xbf16, #tpu.memory_space<vmem>>, vector<1x128xbf16>
    tpu.vector_store %arg8[%c0_17, %c0_18], %26 {strides = array<i32>} : memref<1x128xbf16, #tpu.memory_space<vmem>>, vector<1x128xbf16>,
    return
  }
  func.func @transform_0(%arg0: i32) -> (i32, i32) {
    %c0_i32 = arith.constant 0 : i32
    %c0_i32_0 = arith.constant 0 : i32
    return %arg0, %c0_i32 : i32, i32
  }
  func.func @transform_1(%arg0: i32) -> (i32, i32) {
    %c0_i32 = arith.constant 0 : i32
    %c0_i32_0 = arith.constant 0 : i32
    %c0_i32_1 = arith.constant 0 : i32
    return %c0_i32, %c0_i32_0 : i32, i32
  }
  func.func @transform_2(%arg0: i32) -> (i32, i32) {
    %c0_i32 = arith.constant 0 : i32
    %c0_i32_0 = arith.constant 0 : i32
    %c0_i32_1 = arith.constant 0 : i32
    return %c0_i32, %c0_i32_0 : i32, i32
  }
  func.func @transform_3(%arg0: i32) -> (i32, i32) {
    %c0_i32 = arith.constant 0 : i32
    %c0_i32_0 = arith.constant 0 : i32
    %c0_i32_1 = arith.constant 0 : i32
    return %c0_i32, %c0_i32_0 : i32, i32
  }
  func.func @transform_4(%arg0: i32) -> (i32, i32) {
    %c0_i32 = arith.constant 0 : i32
    %c0_i32_0 = arith.constant 0 : i32
    %c0_i32_1 = arith.constant 0 : i32
    return %c0_i32, %c0_i32_0 : i32, i32
  }
  func.func @transform_5(%arg0: i32) -> (i32, i32) {
    %c0_i32 = arith.constant 0 : i32
    %c0_i32_0 = arith.constant 0 : i32
    %c0_i32_1 = arith.constant 0 : i32
    return %c0_i32, %c0_i32_0 : i32, i32
  }
  func.func @transform_6(%arg0: i32) -> (i32, i32) {
    %c0_i32 = arith.constant 0 : i32
    %c0_i32_0 = arith.constant 0 : i32
    %c0_i32_1 = arith.constant 0 : i32
    return %c0_i32, %c0_i32_0 : i32, i32
  }
  func.func @transform_7(%arg0: i32) -> (i32, i32) {
    %c0_i32 = arith.constant 0 : i32
    %c0_i32_0 = arith.constant 0 : i32
    return %c0_i32, %arg0 : i32, i32
  }
}

</mosaic_0001>

<bundles_post_ra>
// kernel: tpu_custom_call.1
= control target key start
LH: loop header
LB: loop body
LE: loop exit
PB: predicated region body
PF: predicated region fallthrough
CT: control target
= control target key end

     0   :  { %s673_s0 = inlined_call_operand.vmem [shape: f32[128,10], index: 0, kind: input, shape index: {}]   ;;  %s674_s1 = inlined_call_operand.vmem [shape: bf16[64,10], index: 1, kind: input, shape index: {}]   ;;  %s675_s2 = inlined_call_operand.vmem [shape: f32[64,1], index: 2, kind: input, shape index: {}]   ;;  %s676_s3 = inlined_call_operand.vmem [shape: bf16[32,64], index: 3, kind: input, shape index: {}]   ;;  %s677_s4 = inlined_call_operand.vmem [shape: f32[32,1], index: 4, kind: input, shape index: {}]   ;;  %s678_s5 = inlined_call_operand.vmem [shape: f32[32,1], index: 5, kind: input, shape index: {}]   ;;  %s679_s6 = inlined_call_operand.<no memory space> [shape: f32[1,1], index: 6, kind: input, shape index: {}]   ;;  %s680_s7 = inlined_call_operand.hbm [shape: bf16[1,128], index: 7, kind: output, shape index: {}]  }
   0x1   :  { %v12_v0 = vstv %s679_s6 }
   0x2   :  { %13 = vst [vmem:[#allocation2] sm:$0x1] %v12_v0 }
   0x3   :  { %v30_v1 = vld [vmem:[%s673_s0] sm:$0xff]  ;;  %v31_v2 = vld [vmem:[%s673_s0 + $0x8] sm:$0xff]  ;;  %v32_v3 = vld [vmem:[%s673_s0 + $0x10] sm:$0xff]  ;;  %vm155_vm0 = vcmask 80896  }
   0x4   :  { %46 = vxpose.xlu0.b32.start [1/16] (narrow) %v30_v1, 16  ;;  %v466_v4 = vld [vmem:[%s674_s1] sm:$0xff]   ;;  %v33_v5 = vld [vmem:[%s673_s0 + $0x18] sm:$0xff] }
   0x8   :  { %47 = vxpose.xlu0.b32.cont [2/16] (narrow) %v31_v2, 16 }
   0xc   :  { %48 = vxpose.xlu0.b32.cont [3/16] (narrow) %v32_v3, 16 }
   0xd   :  { %14 = vsyncpa [#allocation4], 0  ;;  %441 = vmatprep.mubr.msk.bf16.mxu0 %vm155_vm0, %v466_v4  ;;  %v34_v6 = vld [vmem:[%s673_s0 + $0x20] sm:$0xff]  ;;  %v35_v7 = vld [vmem:[%s673_s0 + $0x28] sm:$0xff]  ;;  %v496_v9 = vmov 0   ;;  %vm168_vm1 = vcmask 1044480  }
   0xe   :  { %v87_v8 = vld [vmem:[%s675_s2] sm:$0xff]  ;;  %464 = vset.pattern.permute.xlu1 %v496_v9  ;;  %v36_v10 = vld [vmem:[%s673_s0 + $0x30] sm:$0xff]  ;;  %v88_v11 = vld [vmem:[%s675_s2 + $0x8] sm:$0xff]  ;;  %vm287_vm2 = vcmask 523264   ;;  %vm396_vm3 = vcmask 1040384  }
   0xf   :  { %97 = vperm.xlu1 %464, %v87_v8   ;;  %v37_v12 = vld [vmem:[%s673_s0 + $0x38] sm:$0xff]  ;;  %v89_v13 = vld [vmem:[%s675_s2 + $0x10] sm:$0xff]  ;;  %v38_v14 = vld [vmem:[%s673_s0 + $0x40] sm:$0xff]  ;;  %vm397_vm4 = vsmask.f32 256 }
  0x10   :  { %49 = vxpose.xlu0.b32.cont [4/16] (narrow) %v33_v5, 16  ;;  %v90_v15 = vld [vmem:[%s675_s2 + $0x18] sm:$0xff]  ;;  %v39_v16 = vld [vmem:[%s673_s0 + $0x48] sm:$0xff]  ;;  %v91_v17 = vld [vmem:[%s675_s2 + $0x20] sm:$0xff] }
  0x11   :  { %v40_v18 = vld [vmem:[%s673_s0 + $0x50] sm:$0xff]  ;;  %v92_v19 = vld [vmem:[%s675_s2 + $0x28] sm:$0xff]  ;;  %v41_v20 = vld [vmem:[%s673_s0 + $0x58] sm:$0xff] }
  0x12   :  { %v93_v21 = vld [vmem:[%s675_s2 + $0x30] sm:$0xff]  ;;  %v42_v22 = vld [vmem:[%s673_s0 + $0x60] sm:$0xff]  ;;  %v94_v23 = vld [vmem:[%s675_s2 + $0x38] sm:$0xff] }
  0x13   :  { %102 = vperm.xlu1 %464, %v88_v11   ;;  %v43_v24 = vld [vmem:[%s673_s0 + $0x68] sm:$0xff]  ;;  %v253_v25 = vld [vmem:[%s677_s4] sm:$0xff]  ;;  %v44_v26 = vld [vmem:[%s673_s0 + $0x70] sm:$0xff] }
  0x14   :  { %50 = vxpose.xlu0.b32.cont [5/16] (narrow) %v34_v6, 16  ;;  %v254_v27 = vld [vmem:[%s677_s4 + $0x8] sm:$0xff]  ;;  %v45_v28 = vld [vmem:[%s673_s0 + $0x78] sm:$0xff]  ;;  %v255_v29 = vld [vmem:[%s677_s4 + $0x10] sm:$0xff] }
  0x15   :  { %v256_v30 = vld [vmem:[%s677_s4 + $0x18] sm:$0xff]  ;;  %v347_v31 = vld [vmem:[%s678_s5] sm:$0xff]  ;;  %v348_v32 = vld [vmem:[%s678_s5 + $0x8] sm:$0xff] }
  0x16   :  { %v349_v33 = vld [vmem:[%s678_s5 + $0x10] sm:$0xff]  ;;  %v350_v34 = vld [vmem:[%s678_s5 + $0x18] sm:$0xff]  ;;  %v467_v39 = vld [vmem:[%s674_s1 + $0x8] sm:$0xff]  }
  0x17   :  { %107 = vperm.xlu1 %464, %v89_v13   ;;  %v468_v40 = vld [vmem:[%s674_s1 + $0x10] sm:$0xff]   ;;  %v469_v41 = vld [vmem:[%s674_s1 + $0x18] sm:$0xff]   ;;  %v470_v42 = vld [vmem:[%s676_s3] sm:$0xff]  }
  0x18   :  { %51 = vxpose.xlu0.b32.cont [6/16] (narrow) %v35_v7, 16  ;;  %457 = vmatprep.mubr.msk.bf16.mxu1 %vm287_vm2, %v470_v42  ;;  %v384_v43 = vld [vmem:[#allocation2] sm:$0x1]  ;;  %vm398_vm5 = vmand %vm396_vm3, %vm397_vm4 }
  0x1b   :  { %112 = vperm.xlu1 %464, %v90_v15  }
  0x1c   :  { %52 = vxpose.xlu0.b32.cont [7/16] (narrow) %v36_v10, 16 }
  0x1f   :  { %117 = vperm.xlu1 %464, %v91_v17  }
  0x20   :  { %53 = vxpose.xlu0.b32.cont [8/16] (narrow) %v37_v12, 16 }
  0x23   :  { %122 = vperm.xlu1 %464, %v92_v19  }
  0x24   :  { %54 = vxpose.xlu0.b32.cont [9/16] (narrow) %v38_v14, 16 }
  0x27   :  { %127 = vperm.xlu1 %464, %v93_v21  }
  0x28   :  { %55 = vxpose.xlu0.b32.cont [10/16] (narrow) %v39_v16, 16  ;;  %v471_v16 = vld [vmem:[%s676_s3 + $0x8] sm:$0xff]   ;;  %s497_s3 = smov [#allocation3]  }
  0x29   :  { %s408_s25 = sshll.u32 %s497_s3, 4  ;;  %s409_s25 = int_to_ptr.vmem [resolvable:$true] %s408_s25 }
  0x2a   :  { %s472_s26 = scalar_lea.vmem %s409_s25, 16  ;;  %s476_s27 = scalar_lea.vmem %s409_s25, 32 }
  0x2b   :  { %132 = vperm.xlu1 %464, %v94_v23   ;;  %p473_p0 = scmp.ne.s32.totalorder %s409_s25, %s472_s26  ;;  %p477_p1 = scmp.lt.s32.totalorder %s409_s25, %s409_s25 }
  0x2c   :  { %56 = vxpose.xlu0.b32.cont [11/16] (narrow) %v40_v18, 16  ;;  %p478_p2 = scmp.lt.s32.totalorder %s476_s27, %s472_s26 }
  0x2e   :  { %p479_p3 = por %p478_p2, %p477_p1 }
  0x2f   :  { %259 = vperm.xlu1 %464, %v253_v25  }
  0x30   :  { %57 = vxpose.xlu0.b32.cont [12/16] (narrow) %v41_v20, 16  ;;  %p480_p4 = pnand %p479_p3, %p473_p0 }
  0x33   :  { %264 = vperm.xlu1 %464, %v254_v27  }
  0x34   :  { %58 = vxpose.xlu0.b32.cont [13/16] (narrow) %v42_v22, 16 }
  0x37   :  { %269 = vperm.xlu1 %464, %v255_v29  }
  0x38   :  { %59 = vxpose.xlu0.b32.cont [14/16] (narrow) %v43_v24, 16 }
  0x3b   :  { %274 = vperm.xlu1 %464, %v256_v30  }
  0x3c   :  { %60 = vxpose.xlu0.b32.cont [15/16] (narrow) %v44_v26, 16 }
  0x3f   :  { %353 = vperm.xlu1 %464, %v347_v31  }
  0x40   :  { %61 = vxpose.xlu0.b32.end [16/16] (narrow) %v45_v28, 16 }
  0x43   :  { %358 = vperm.xlu1 %464, %v348_v32  }
  0x47   :  { %363 = vperm.xlu1 %464, %v349_v33  }
  0x4b   :  { %368 = vperm.xlu1 %464, %v350_v34  }
  0x69   :  { %465 = vset.pattern.permute.xlu0 %v496_v9 }
  0x6a   :  { %387 = vperm.xlu0 %465, %v384_v43   ;;  %v390_v43 = vlaneseq }
  0x84   :  { %v62_v35 = vpop.trf.xlu0 }
  0x88   :  { %v63_v36 = vpop.trf.xlu0 }
  0x89   :  { %v78_v37 = vpack.c.bf16 %v63_v36, %v62_v35 }
  0x8b   :  { %461 = vmatprep.subr.msk.bf16.mxu0 %vm168_vm1, %v78_v37  ;;  %v170_v38 = vsel %vm168_vm1, %v78_v37, 0 }
  0x8c   :  { %440 = vmatpush3.bf16.msra.mxu0 %v170_v38 }
  0x8e   :  { %v98_v44 = vpop.permute.xlu1 %97 }
  0x8f   :  { %442 = vmatmul.mubr.msk.bf16.vlgmr.msra.gmra.mrb[0].mxu0 %vm155_vm0, %v467_v39 }
  0x90   :  { %445 = vmatprep.mubr.msk.bf16.mxu0 %vm155_vm0, %v468_v40 }
  0x92   :  { %v103_v45 = vpop.permute.xlu1 %102 }
  0x96   :  { %v108_v46 = vpop.permute.xlu1 %107 }
  0x97   :  { %446 = vmatmul.mubr.msk.bf16.gmra.mrb[4].mxu0 %vm155_vm0, %v469_v41 }
  0x9a   :  { %v113_v47 = vpop.permute.xlu1 %112 }
  0x9e   :  { %v118_v48 = vpop.permute.xlu1 %117 }
  0xa2   :  { %v123_v49 = vpop.permute.xlu1 %122 }
  0xa6   :  { %v128_v57 = vpop.permute.xlu1 %127 }
  0xaa   :  { %v133_v4 = vpop.permute.xlu1 %132 }
  0xae   :  { %v260_v17 = vpop.permute.xlu1 %259 }
  0xb2   :  { %v265_v18 = vpop.permute.xlu1 %264 }
  0xb6   :  { %v270_v19 = vpop.permute.xlu1 %269 }
  0xba   :  { %v275_v20 = vpop.permute.xlu1 %274 }
  0xbe   :  { %v354_v21 = vpop.permute.xlu1 %353 }
  0xc2   :  { %v359_v22 = vpop.permute.xlu1 %358 }
  0xc6   :  { %v364_v32 = vpop.permute.xlu1 %363 }
  0xca   :  { %v369_v40 = vpop.permute.xlu1 %368 }
 0x162   :  { %v443_v50 = vpop.f32.mrb[0].mxu0 }
 0x163   :  { %v215_v51 = vadd.f32 %v443_v50, %v108_v46  ;;  %v206_v52 = vpop.f32.mrb[1].mxu0  ;;  %v391_v46 = vshrl.u32 %v390_v43, 7  ;;  %v388_v50 = vpop.permute.xlu0 %387 }
 0x164   :  { %v207_v53 = vadd.f32 %v206_v52, %v98_v44  ;;  %v444_v54 = vpop.f32.mrb[2].mxu0 }
 0x165   :  { %v218_v55 = vadd.f32 %v444_v54, %v113_v47  ;;  %v209_v56 = vpop.f32.mrb[3].mxu0  ;;  %v239_v59 = vmax.f32 %v215_v51, 0.0 }
 0x166   :  { %v210_v58 = vadd.f32 %v209_v56, %v103_v45  ;;  %v237_v61 = vmax.f32 %v207_v53, 0.0  ;;  %v399_v56 = vld [vmem:[#allocation3] sm:$0x1] }
 0x167   :  { %v240_v60 = vmax.f32 %v218_v55, 0.0 }
 0x168   :  { %v238_v62 = vmax.f32 %v210_v58, 0.0 }
 0x169   :  { %v246_v63 = vpack.c.bf16 %v240_v60, %v239_v59 }
 0x16a   :  { %v447_v0 = vpop.f32.mrb[4].mxu0  ;;  %v245_v1 = vpack.c.bf16 %v238_v62, %v237_v61 }
 0x16b   :  { %v231_v2 = vadd.f32 %v447_v0, %v128_v57  ;;  %v222_v3 = vpop.f32.mrb[5].mxu0 }
 0x16c   :  { %v223_v5 = vadd.f32 %v222_v3, %v118_v48  ;;  %v448_v6 = vpop.f32.mrb[6].mxu0  ;;  %449 = vmatprep.subr.bf16.mxu1 %v245_v1 }
 0x16d   :  { %v234_v7 = vadd.f32 %v448_v6, %v133_v4  ;;  %v225_v8 = vpop.f32.mrb[7].mxu0  ;;  %450 = vmatpush3.bf16.msra.mxu1 %v245_v1  ;;  %v243_v10 = vmax.f32 %v231_v2, 0.0 }
 0x16e   :  { %v226_v9 = vadd.f32 %v225_v8, %v123_v49  ;;  %451 = vmatprep.subr.bf16.mxu1 %v246_v63  ;;  %v241_v12 = vmax.f32 %v223_v5, 0.0  ;;  %v392_v49 = vsub.s32 0, %v391_v46 }
 0x16f   :  { %v244_v11 = vmax.f32 %v234_v7, 0.0 }
 0x170   :  { %v242_v13 = vmax.f32 %v226_v9, 0.0  ;;  %v393_v53 = vrot.slane %v388_v50, %v392_v49 }
 0x171   :  { %v248_v14 = vpack.c.bf16 %v244_v11, %v243_v10  ;;  %452 = vmatpush3.bf16.msra.mxu1 %v246_v63 }
 0x172   :  { %v247_v15 = vpack.c.bf16 %v242_v13, %v241_v12 }
 0x174   :  { %453 = vmatprep.subr.bf16.mxu1 %v247_v15 }
 0x175   :  { %454 = vmatpush3.bf16.msra.mxu1 %v247_v15 }
 0x176   :  { %455 = vmatprep.subr.bf16.mxu1 %v248_v14 }
 0x179   :  { %456 = vmatpush3.bf16.msra.mxu1 %v248_v14 }
 0x17c   :  { %458 = vmatmul.mubr.msk.bf16.vlgmr.msra.gmra.mrb[0].mxu1 %vm287_vm2, %v471_v16 }
 0x24f   :  { %v459_v23 = vpop.f32.mrb[0].mxu1 }
 0x250   :  { %v328_v24 = vpop.f32.mrb[1].mxu1  ;;  %v337_v25 = vadd.f32 %v459_v23, %v270_v19 }
 0x251   :  { %v329_v26 = vadd.f32 %v328_v24, %v260_v17  ;;  %v460_v27 = vpop.f32.mrb[2].mxu1 }
 0x252   :  { %v331_v28 = vpop.f32.mrb[3].mxu1  ;;  %v340_v30 = vadd.f32 %v460_v27, %v275_v20  ;;  %v345_v33 = vmax.f32 %v337_v25, 0.0 }
 0x253   :  { %v343_v29 = vmax.f32 %v329_v26, 0.0  ;;  %v332_v31 = vadd.f32 %v331_v28, %v265_v18 }
 0x254   :  { %v346_v36 = vmax.f32 %v340_v30, 0.0  ;;  %v373_v38 = vmul.f32 %v364_v32, %v345_v33 }
 0x255   :  { %v344_v34 = vmax.f32 %v332_v31, 0.0  ;;  %v371_v35 = vmul.f32 %v354_v21, %v343_v29 }
 0x256   :  { %v374_v41 = vmul.f32 %v369_v40, %v346_v36 }
 0x257   :  { %v372_v37 = vmul.f32 %v359_v22, %v344_v34 }
 0x259   :  { %v375_v39 = vadd.f32 %v372_v37, %v371_v35 }
 0x25b   :  { %v376_v42 = vadd.f32 %v375_v39, %v373_v38 }
 0x25d   :  { %v377_v44 = vadd.f32 %v376_v42, %v374_v41 }
 0x25f   :  { %v378_v45 = vrot.slane %v377_v44, 4 }
 0x261   :  { %v379_v47 = vadd.f32 %v378_v45, %v377_v44 }
 0x263   :  { %v380_v48 = vrot.slane %v379_v47, 2 }
 0x265   :  { %v381_v51 = vadd.f32 %v380_v48, %v379_v47 }
 0x267   :  { %v382_v52 = vrot.slane %v381_v51, 1 }
 0x269   :  { %v383_v54 = vadd.f32 %v382_v52, %v381_v51 }
 0x26b   :  { %v394_v55 = vadd.f32 %v393_v53, %v383_v54 }
 0x26d   :  { %v395_v57 = vpack.c.bf16 %v394_v55, %v394_v55 }
 0x26f   :  { %v400_v58 = vsel %vm398_vm5, %v395_v57, %v399_v56 }
 0x270   :  { %401 = vst [vmem:[#allocation3] sm:$0x1] %v400_v58 }
 0x271   :  { %483 = shalt.err (!%p480_p4)
}
 0x272   :  { %s484_s2 = scalar_lea.hbm %s680_s7, 16 }
 0x273   :  { %p485_p5 = scmp.ne.s32.totalorder %s680_s7, %s484_s2  ;;  %p488_p6 = scmp.lt.u32.totalorder %s484_s2, %s680_s7 }
 0x275   :  { %p490_p7 = pnand %p488_p6, %p485_p5 }
 0x277   :  { %493 = shalt.err (!%p490_p7)
}
 0x278   :  { %411 = dma.vmem_to_hbm [thread:$0]  %s409_s25, 16, %s680_s7, [#allocation4]  }
 0x279   :  { %494 = dma.done.wait [#allocation4], 16  }
 0x27a   :  { %495 = vsyncadd [#allocation4], 4294967280 }
 0x27b   :  { %415 = vsyncpa [#allocation4], 1 }

</bundles_post_ra>
